<compile_context>
chip_gen: v5e
topology: v5e:2x2
jax: 0.10.0
libtpu: 0.0.40
codegen_flags: <defaults>
</compile_context>

<pallas_src>
import functools

import jax
import jax.numpy as jnp
from jax.experimental import pallas as pl
from jax.experimental.pallas import tpu as pltpu


def _round_up(n, m):
    return ((n + m - 1) // m) * m


def _bf16_eup_ok():
    """bf16 transcendentals exist on v6e/v7x EUP; v5e and older do not — keep f32 there."""
    try:
        kind = jax.devices()[0].device_kind.lower()
    except Exception:
        return False
    return not any(old in kind for old in ("v2", "v3", "v4", "v5"))


def _mlp_kernel(num_linear, bf16_eup, *refs):
    """Fused MLP forward for one batch block.

    refs = (x_ref, w0, b0, w1, b1, ..., w_{L-1}, b_{L-1}, out_ref)
      x_ref : f32  [block_b, in_dim]     (unpadded lanes; cast to bf16 here)
      w_i   : bf16 [k_i, n_pad_i]        (output dim zero-padded to a multiple of 128)
      b_i   : f32  [1, n_pad_i]
      out   : bf16 [block_b, n_pad_last]
    """
    x_ref = refs[0]
    out_ref = refs[-1]
    param_refs = refs[1:-1]

    h = x_ref[...].astype(jnp.bfloat16)              # bf16 activations into the MXU
    for i in range(num_linear):
        w = param_refs[2 * i][...]                   # bf16 [k, n_pad]
        b = param_refs[2 * i + 1][...]               # f32  [1, n_pad]
        acc = jnp.dot(h, w, preferred_element_type=jnp.float32) + b
        if i < num_linear - 1:
            # sigmoid(x) = 0.5*tanh(0.5*x) + 0.5: transcendental on the EUP slot,
            # only mul+add on the VPU (no f32 divide on the VALU).
            t = 0.5 * acc
            if bf16_eup:
                t = t.astype(jnp.bfloat16)           # ~2x EUP throughput on v6e/v7x
            h = (0.5 * jnp.tanh(t) + 0.5).astype(jnp.bfloat16)
        else:
            h = acc                                  # final logits accumulate in f32
    # TODO(synk): if bundle dumps ever show vreg spills with very large blocks, iterate
    # the layer stack over 256-row sub-slices with lax.fori_loop(..., unroll=True) while
    # keeping the big BlockSpec for DMA granularity.
    out_ref[...] = h.astype(out_ref.dtype)           # bf16 writeback (halves HBM stores)


def simple_neural_network_forward(x, weights, biases, *, max_block_b=2048):
    """x: [B, input_size] f32; weights[i]: [in_i, out_i] f32; biases[i]: [1, out_i] f32.

    Returns f32 [B, num_classes] logits.
    """
    num_linear = len(weights)
    batch, in_dim = x.shape
    num_classes = weights[-1].shape[1]

    # Feature dims: the first layer's K stays unpadded (MXU handles small K fine);
    # every layer's output dim is padded to a lane-dense multiple of 128.
    out_dims = [w.shape[1] for w in weights]
    pdims = [in_dim] + [_round_up(d, 128) for d in out_dims]

    # Batch blocking. No batch padding: the ragged last block is masked on writeback
    # (safe — rows are independent, no cross-row reduction in the kernel).
    if batch >= max_block_b:
        # Keep >= 2 grid steps so ("parallel",) can shard across v7x's 2 TensorCores;
        # effectively a no-op on single-TC v5e/v6e.
        block_b = min(max_block_b, _round_up(pl.cdiv(batch, 2), 256))
    else:
        # Single block; 16-row granularity keeps bf16 sublane packing dense.
        block_b = batch if batch % 8 == 0 else _round_up(batch, 16)
    grid = (pl.cdiv(batch, block_b),)

    x = x.astype(jnp.float32)   # no wrapper-side pad/copy; bf16 cast happens in-kernel

    # Pad + cast params once (weights bf16, biases f32). Padded weight rows are zero so
    # sigmoid(0)=0.5 activations in padded hidden columns contribute nothing downstream.
    flat_params = []
    for i, (w, b) in enumerate(zip(weights, biases)):
        wp = jnp.zeros((pdims[i], pdims[i + 1]), jnp.bfloat16)
        wp = wp.at[: w.shape[0], : w.shape[1]].set(w.astype(jnp.bfloat16))
        bp = jnp.zeros((1, pdims[i + 1]), jnp.float32)
        bp = bp.at[:, : b.shape[1]].set(b.astype(jnp.float32))
        flat_params.append(wp)
        flat_params.append(bp)

    # BlockSpecs: x/out tiled over batch; weights/biases full-array residents
    # (constant index_map -> DMA'd once, reused across batch blocks).
    x_spec = pl.BlockSpec((block_b, in_dim), lambda i: (i, 0))
    param_specs = []
    for i in range(num_linear):
        param_specs.append(pl.BlockSpec((pdims[i], pdims[i + 1]), lambda i_: (0, 0)))
        param_specs.append(pl.BlockSpec((1, pdims[i + 1]), lambda i_: (0, 0)))
    out_spec = pl.BlockSpec((block_b, pdims[-1]), lambda i: (i, 0))

    # Advisory cost estimate for XLA's scheduler.
    flops = 2 * batch * sum(pdims[i] * pdims[i + 1] for i in range(num_linear))
    transcendentals = batch * sum(pdims[i + 1] for i in range(num_linear - 1))
    bytes_accessed = (
        batch * in_dim * 4
        + sum(p.size * p.dtype.itemsize for p in flat_params)
        + batch * pdims[-1] * 2
    )

    kernel = functools.partial(_mlp_kernel, num_linear, _bf16_eup_ok())

    # TODO(synk): if hidden_size is scaled up (full-resident [H,H] bf16 weights blow the
    # 32 MiB scoped-VMEM default around H~4096 and v7x's 64 MiB physical VMEM around
    # H~5792), tile the weight N (output) dim per layer and set
    # pltpu.CompilerParams(vmem_limit_bytes=...) accordingly.
    out_padded = pl.pallas_call(
        kernel,
        out_shape=jax.ShapeDtypeStruct((batch, pdims[-1]), jnp.bfloat16),
        grid=grid,
        in_specs=[x_spec] + param_specs,
        out_specs=out_spec,
        compiler_params=pltpu.CompilerParams(
            dimension_semantics=("parallel",),   # batch blocks shard across v7x's 2 TCs
        ),
        cost_estimate=pl.CostEstimate(
            flops=flops,
            transcendentals=transcendentals,
            bytes_accessed=bytes_accessed,
        ),
    )(x, *flat_params)

    # Slice away padded classes and return f32 logits for callers.
    return out_padded[:batch, :num_classes].astype(jnp.float32)


def init_params(key, input_size, hidden_size, num_layers, num_classes):
    """PyTorch-Linear-style init: U(-1/sqrt(fan_in), 1/sqrt(fan_in)).

    Weights stored transposed relative to torch ([in, out]) so the kernel computes x @ W + b.
    """
    dims = [input_size] + [hidden_size] * num_layers + [num_classes]
    weights, biases = [], []
    for i in range(len(dims) - 1):
        fan_in, fan_out = dims[i], dims[i + 1]
        key, kw, kb = jax.random.split(key, 3)
        bound = 1.0 / jnp.sqrt(jnp.float32(fan_in))
        w = jax.random.uniform(kw, (fan_in, fan_out), jnp.float32, -bound, bound)
        b = jax.random.uniform(kb, (1, fan_out), jnp.float32, -bound, bound)
        weights.append(w)
        biases.append(b)
    return weights, biases


def reference_forward(x, weights, biases):
    """Pure-JAX reference using the same mixed precision (bf16 operands, f32 accumulate)."""
    h = x.astype(jnp.bfloat16)
    n = len(weights)
    for i, (w, b) in enumerate(zip(weights, biases)):
        h = jnp.dot(h, w.astype(jnp.bfloat16), preferred_element_type=jnp.float32) + b
        if i < n - 1:
            h = jax.nn.sigmoid(h).astype(jnp.bfloat16)
    return h


if __name__ == "__main__":
    # Small shapes consistent with the module.
    input_size = 32
    hidden_size = 32
    num_layers = 3          # Linear+Sigmoid, (num_layers-1) more hidden Linear+Sigmoid, then head
    num_classes = 10
    batch = 8

    key = jax.random.PRNGKey(0)
    key, kx = jax.random.split(key)
    x = jax.random.normal(kx, (batch, input_size), dtype=jnp.float32)

    weights, biases = init_params(key, input_size, hidden_size, num_layers, num_classes)

    out = simple_neural_network_forward(x, weights, biases)
    out = jax.block_until_ready(out)
    ref = reference_forward(x, weights, biases)
    assert out.shape == (batch, num_classes)
    assert out.dtype == jnp.float32
    # Tolerance covers the tanh-form sigmoid, optional bf16 tanh argument on v6e/v7x,
    # and the bf16 rounding of weights/activations/logits.
    assert jnp.allclose(out, ref, atol=3e-2, rtol=3e-2), "mismatch vs pure-JAX reference"

    # Also exercise the multi-block grid + ragged-last-block path at small size.
    batch2 = 300
    key, kx2 = jax.random.split(key)
    x2 = jax.random.normal(kx2, (batch2, input_size), dtype=jnp.float32)
    out2 = jax.block_until_ready(
        simple_neural_network_forward(x2, weights, biases, max_block_b=128)
    )
    ref2 = reference_forward(x2, weights, biases)
    assert out2.shape == (batch2, num_classes)
    assert jnp.allclose(out2, ref2, atol=3e-2, rtol=3e-2), "mismatch on ragged multi-block path"

    print("KERNEL_OK")
</pallas_src>

<mosaic_0001>
module attributes {stable_mosaic.version = 11 : i64} {
  func.func @_mlp_kernel(%arg0: i32, %arg1: memref<8x32xf32, #tpu.memory_space<vmem>>, %arg2: memref<32x128xbf16, #tpu.memory_space<vmem>>, %arg3: memref<1x128xf32, #tpu.memory_space<vmem>>, %arg4: memref<128x128xbf16, #tpu.memory_space<vmem>>, %arg5: memref<1x128xf32, #tpu.memory_space<vmem>>, %arg6: memref<128x128xbf16, #tpu.memory_space<vmem>>, %arg7: memref<1x128xf32, #tpu.memory_space<vmem>>, %arg8: memref<128x128xbf16, #tpu.memory_space<vmem>>, %arg9: memref<1x128xf32, #tpu.memory_space<vmem>>, %arg10: memref<8x128xbf16, #tpu.memory_space<vmem>>) attributes {dimension_semantics = [#tpu.dimension_semantics<parallel>], iteration_bounds = array<i64: 1>, scalar_prefetch = 0 : i64, scratch_operands = 0 : i64, tpu.core_type = #tpu.core_type<tc>, window_params = [{transform_indices = @transform_0, window_bounds = array<i64: 8, 32>}, {pipeline_mode = #tpu.pipeline_mode<synchronous>, transform_indices = @transform_1, window_bounds = array<i64: 32, 128>}, {pipeline_mode = #tpu.pipeline_mode<synchronous>, transform_indices = @transform_2, window_bounds = array<i64: 1, 128>}, {pipeline_mode = #tpu.pipeline_mode<synchronous>, transform_indices = @transform_3, window_bounds = array<i64: 128, 128>}, {pipeline_mode = #tpu.pipeline_mode<synchronous>, transform_indices = @transform_4, window_bounds = array<i64: 1, 128>}, {pipeline_mode = #tpu.pipeline_mode<synchronous>, transform_indices = @transform_5, window_bounds = array<i64: 128, 128>}, {pipeline_mode = #tpu.pipeline_mode<synchronous>, transform_indices = @transform_6, window_bounds = array<i64: 1, 128>}, {pipeline_mode = #tpu.pipeline_mode<synchronous>, transform_indices = @transform_7, window_bounds = array<i64: 128, 128>}, {pipeline_mode = #tpu.pipeline_mode<synchronous>, transform_indices = @transform_8, window_bounds = array<i64: 1, 128>}, {transform_indices = @transform_9, window_bounds = array<i64: 8, 128>}]} {
    %c0 = arith.constant 0 : index
    %c0_0 = arith.constant 0 : index
    %0 = vector.load %arg1[%c0, %c0_0] : memref<8x32xf32, #tpu.memory_space<vmem>>, vector<8x32xf32>
    %1 = arith.truncf %0 : vector<8x32xf32> to vector<8x32xbf16>
    %c0_1 = arith.constant 0 : index
    %c0_2 = arith.constant 0 : index
    %2 = vector.load %arg2[%c0_1, %c0_2] : memref<32x128xbf16, #tpu.memory_space<vmem>>, vector<32x128xbf16>
    %c0_3 = arith.constant 0 : index
    %c0_4 = arith.constant 0 : index
    %3 = vector.load %arg3[%c0_3, %c0_4] : memref<1x128xf32, #tpu.memory_space<vmem>>, vector<1x128xf32>
    %cst = arith.constant dense<0.000000e+00> : vector<8x128xf32>
    %4 = tpu.matmul %1, %2, %cst {dimension_numbers = #tpu.dot_dimension_numbers<[1], [0], [0], [1], [0, 0, 1, 1], [], []>} : vector<8x32xbf16>, vector<32x128xbf16>, vector<8x128xf32> -> vector<8x128xf32>
    %5 = vector.broadcast %3 : vector<1x128xf32> to vector<8x128xf32>
    %6 = arith.addf %4, %5 : vector<8x128xf32>
    %cst_5 = arith.constant 5.000000e-01 : f32
    %7 = vector.broadcast %cst_5 : f32 to vector<8x128xf32>
    %8 = arith.mulf %7, %6 : vector<8x128xf32>
    %9 = arith.truncf %8 : vector<8x128xf32> to vector<8x128xbf16>
    %10 = math.tanh %9 : vector<8x128xbf16>
    %cst_6 = arith.constant 5.000000e-01 : bf16
    %11 = vector.broadcast %cst_6 : bf16 to vector<8x128xbf16>
    %12 = arith.mulf %11, %10 : vector<8x128xbf16>
    %cst_7 = arith.constant 5.000000e-01 : bf16
    %13 = vector.broadcast %cst_7 : bf16 to vector<8x128xbf16>
    %14 = arith.addf %12, %13 : vector<8x128xbf16>
    %c0_8 = arith.constant 0 : index
    %c0_9 = arith.constant 0 : index
    %15 = vector.load %arg4[%c0_8, %c0_9] : memref<128x128xbf16, #tpu.memory_space<vmem>>, vector<128x128xbf16>
    %c0_10 = arith.constant 0 : index
    %c0_11 = arith.constant 0 : index
    %16 = vector.load %arg5[%c0_10, %c0_11] : memref<1x128xf32, #tpu.memory_space<vmem>>, vector<1x128xf32>
    %cst_12 = arith.constant dense<0.000000e+00> : vector<8x128xf32>
    %17 = tpu.matmul %14, %15, %cst_12 {dimension_numbers = #tpu.dot_dimension_numbers<[1], [0], [0], [1], [0, 0, 1, 1], [], []>} : vector<8x128xbf16>, vector<128x128xbf16>, vector<8x128xf32> -> vector<8x128xf32>
    %18 = vector.broadcast %16 : vector<1x128xf32> to vector<8x128xf32>
    %19 = arith.addf %17, %18 : vector<8x128xf32>
    %cst_13 = arith.constant 5.000000e-01 : f32
    %20 = vector.broadcast %cst_13 : f32 to vector<8x128xf32>
    %21 = arith.mulf %20, %19 : vector<8x128xf32>
    %22 = arith.truncf %21 : vector<8x128xf32> to vector<8x128xbf16>
    %23 = math.tanh %22 : vector<8x128xbf16>
    %cst_14 = arith.constant 5.000000e-01 : bf16
    %24 = vector.broadcast %cst_14 : bf16 to vector<8x128xbf16>
    %25 = arith.mulf %24, %23 : vector<8x128xbf16>
    %cst_15 = arith.constant 5.000000e-01 : bf16
    %26 = vector.broadcast %cst_15 : bf16 to vector<8x128xbf16>
    %27 = arith.addf %25, %26 : vector<8x128xbf16>
    %c0_16 = arith.constant 0 : index
    %c0_17 = arith.constant 0 : index
    %28 = vector.load %arg6[%c0_16, %c0_17] : memref<128x128xbf16, #tpu.memory_space<vmem>>, vector<128x128xbf16>
    %c0_18 = arith.constant 0 : index
    %c0_19 = arith.constant 0 : index
    %29 = vector.load %arg7[%c0_18, %c0_19] : memref<1x128xf32, #tpu.memory_space<vmem>>, vector<1x128xf32>
    %cst_20 = arith.constant dense<0.000000e+00> : vector<8x128xf32>
    %30 = tpu.matmul %27, %28, %cst_20 {dimension_numbers = #tpu.dot_dimension_numbers<[1], [0], [0], [1], [0, 0, 1, 1], [], []>} : vector<8x128xbf16>, vector<128x128xbf16>, vector<8x128xf32> -> vector<8x128xf32>
    %31 = vector.broadcast %29 : vector<1x128xf32> to vector<8x128xf32>
    %32 = arith.addf %30, %31 : vector<8x128xf32>
    %cst_21 = arith.constant 5.000000e-01 : f32
    %33 = vector.broadcast %cst_21 : f32 to vector<8x128xf32>
    %34 = arith.mulf %33, %32 : vector<8x128xf32>
    %35 = arith.truncf %34 : vector<8x128xf32> to vector<8x128xbf16>
    %36 = math.tanh %35 : vector<8x128xbf16>
    %cst_22 = arith.constant 5.000000e-01 : bf16
    %37 = vector.broadcast %cst_22 : bf16 to vector<8x128xbf16>
    %38 = arith.mulf %37, %36 : vector<8x128xbf16>
    %cst_23 = arith.constant 5.000000e-01 : bf16
    %39 = vector.broadcast %cst_23 : bf16 to vector<8x128xbf16>
    %40 = arith.addf %38, %39 : vector<8x128xbf16>
    %c0_24 = arith.constant 0 : index
    %c0_25 = arith.constant 0 : index
    %41 = vector.load %arg8[%c0_24, %c0_25] : memref<128x128xbf16, #tpu.memory_space<vmem>>, vector<128x128xbf16>
    %c0_26 = arith.constant 0 : index
    %c0_27 = arith.constant 0 : index
    %42 = vector.load %arg9[%c0_26, %c0_27] : memref<1x128xf32, #tpu.memory_space<vmem>>, vector<1x128xf32>
    %cst_28 = arith.constant dense<0.000000e+00> : vector<8x128xf32>
    %43 = tpu.matmul %40, %41, %cst_28 {dimension_numbers = #tpu.dot_dimension_numbers<[1], [0], [0], [1], [0, 0, 1, 1], [], []>} : vector<8x128xbf16>, vector<128x128xbf16>, vector<8x128xf32> -> vector<8x128xf32>
    %44 = vector.broadcast %42 : vector<1x128xf32> to vector<8x128xf32>
    %45 = arith.addf %43, %44 : vector<8x128xf32>
    %46 = arith.truncf %45 : vector<8x128xf32> to vector<8x128xbf16>
    %c0_29 = arith.constant 0 : index
    %c0_30 = arith.constant 0 : index
    %47 = vector.load %arg10[%c0_29, %c0_30] : memref<8x128xbf16, #tpu.memory_space<vmem>>, vector<8x128xbf16>
    tpu.vector_store %arg10[%c0_29, %c0_30], %46 {strides = array<i32>} : memref<8x128xbf16, #tpu.memory_space<vmem>>, vector<8x128xbf16>,
    return
  }
  func.func @transform_0(%arg0: i32) -> (i32, i32) {
    %c0_i32 = arith.constant 0 : i32
    %c0_i32_0 = arith.constant 0 : i32
    return %arg0, %c0_i32 : i32, i32
  }
  func.func @transform_1(%arg0: i32) -> (i32, i32) {
    %c0_i32 = arith.constant 0 : i32
    %c0_i32_0 = arith.constant 0 : i32
    %c0_i32_1 = arith.constant 0 : i32
    return %c0_i32, %c0_i32_0 : i32, i32
  }
  func.func @transform_2(%arg0: i32) -> (i32, i32) {
    %c0_i32 = arith.constant 0 : i32
    %c0_i32_0 = arith.constant 0 : i32
    %c0_i32_1 = arith.constant 0 : i32
    return %c0_i32, %c0_i32_0 : i32, i32
  }
  func.func @transform_3(%arg0: i32) -> (i32, i32) {
    %c0_i32 = arith.constant 0 : i32
    %c0_i32_0 = arith.constant 0 : i32
    %c0_i32_1 = arith.constant 0 : i32
    return %c0_i32, %c0_i32_0 : i32, i32
  }
  func.func @transform_4(%arg0: i32) -> (i32, i32) {
    %c0_i32 = arith.constant 0 : i32
    %c0_i32_0 = arith.constant 0 : i32
    %c0_i32_1 = arith.constant 0 : i32
    return %c0_i32, %c0_i32_0 : i32, i32
  }
  func.func @transform_5(%arg0: i32) -> (i32, i32) {
    %c0_i32 = arith.constant 0 : i32
    %c0_i32_0 = arith.constant 0 : i32
    %c0_i32_1 = arith.constant 0 : i32
    return %c0_i32, %c0_i32_0 : i32, i32
  }
  func.func @transform_6(%arg0: i32) -> (i32, i32) {
    %c0_i32 = arith.constant 0 : i32
    %c0_i32_0 = arith.constant 0 : i32
    %c0_i32_1 = arith.constant 0 : i32
    return %c0_i32, %c0_i32_0 : i32, i32
  }
  func.func @transform_7(%arg0: i32) -> (i32, i32) {
    %c0_i32 = arith.constant 0 : i32
    %c0_i32_0 = arith.constant 0 : i32
    %c0_i32_1 = arith.constant 0 : i32
    return %c0_i32, %c0_i32_0 : i32, i32
  }
  func.func @transform_8(%arg0: i32) -> (i32, i32) {
    %c0_i32 = arith.constant 0 : i32
    %c0_i32_0 = arith.constant 0 : i32
    %c0_i32_1 = arith.constant 0 : i32
    return %c0_i32, %c0_i32_0 : i32, i32
  }
  func.func @transform_9(%arg0: i32) -> (i32, i32) {
    %c0_i32 = arith.constant 0 : i32
    %c0_i32_0 = arith.constant 0 : i32
    return %arg0, %c0_i32 : i32, i32
  }
}

</mosaic_0001>

<bundles_post_ra>
// kernel: tpu_custom_call.1
= control target key start
LH: loop header
LB: loop body
LE: loop exit
PB: predicated region body
PF: predicated region fallthrough
CT: control target
= control target key end

     0   :  { %14 = vsyncpa [#allocation3], 0  ;;  %s835_s0 = inlined_call_operand.hbm [shape: f32[8,32], index: 0, kind: input, shape index: {}]   ;;  %s836_s1 = inlined_call_operand.hbm [shape: bf16[32,128], index: 1, kind: input, shape index: {}]   ;;  %s837_s2 = inlined_call_operand.vmem [shape: f32[1,128], index: 2, kind: input, shape index: {}]   ;;  %s838_s3 = inlined_call_operand.hbm [shape: bf16[128,128], index: 3, kind: input, shape index: {}]   ;;  %s839_s4 = inlined_call_operand.vmem [shape: f32[1,128], index: 4, kind: input, shape index: {}]   ;;  %s840_s5 = inlined_call_operand.hbm [shape: bf16[128,128], index: 5, kind: input, shape index: {}]   ;;  %s841_s6 = inlined_call_operand.vmem [shape: f32[1,128], index: 6, kind: input, shape index: {}]   ;;  %s842_s7 = inlined_call_operand.hbm [shape: bf16[128,128], index: 7, kind: input, shape index: {}]   ;;  %s843_s8 = inlined_call_operand.vmem [shape: f32[1,128], index: 8, kind: input, shape index: {}]   ;;  %s844_s9 = inlined_call_operand.hbm [shape: bf16[8,128], index: 9, kind: output, shape index: {}]  }
   0x1   :  { %15 = vsyncpa [#allocation6], 0 }
   0x2   :  { %16 = vsyncpa [#allocation9], 0  ;;  %s33_s11 = sshll.u32 %s836_s1, 4  ;;  %s34_s11 = int_to_ptr.hbm [resolvable:$true] %s33_s11 }
   0x3   :  { %17 = vsyncpa [#allocation4], 0  ;;  %s747_s12 = smov [#allocation5]   ;;  %s63_s16 = sshll.u32 %s840_s5, 4  ;;  %s64_s16 = int_to_ptr.hbm [resolvable:$true] %s63_s16 }
   0x4   :  { %s35_s13 = sshll.u32 %s747_s12, 4  ;;  %s748_s17 = smov 64   ;;  %s36_s13 = int_to_ptr.vmem [resolvable:$true] %s35_s13 }
   0x5   :  { %s749_s18 = smov 4   ;;  %s750_s19 = smov [#allocation8]  }
   0x6   :  { %41 = dma.hbm_to_vmem [thread:$0]  %s34_s11, 256, %s36_s13, [#allocation6], %s748_s17, %s748_s17, %s749_s18  }
   0x7   :  { %s65_s20 = sshll.u32 %s750_s19, 4  ;;  %s23_s23 = sshll.u32 %s835_s0, 4  ;;  %s66_s20 = int_to_ptr.vmem [resolvable:$true] %s65_s20  ;;  %s24_s23 = int_to_ptr.hbm [resolvable:$true] %s23_s23 }
   0x8   :  { %71 = dma.hbm_to_vmem [thread:$0]  %s64_s16, 1024, %s66_s20, [#allocation9], %s748_s17, %s748_s17, %s749_s18  }
   0x9   :  { %s48_s25 = sshll.u32 %s838_s3, 4  ;;  %s751_s26 = smov [#allocation2]   ;;  %s49_s25 = int_to_ptr.hbm [resolvable:$true] %s48_s25 }
   0xa   :  { %s25_s27 = sshll.u32 %s751_s26, 4  ;;  %s752_s5 = smov [#allocation7]   ;;  %s26_s27 = int_to_ptr.vmem [resolvable:$true] %s25_s27 }
   0xb   :  { %28 = dma.hbm_to_vmem [thread:$0]  %s24_s23, 128, %s26_s27, [#allocation3]  }
   0xc   :  { %s50_s28 = sshll.u32 %s752_s5, 4  ;;  %s78_s10 = sshll.u32 %s842_s7, 4  ;;  %s51_s28 = int_to_ptr.vmem [resolvable:$true] %s50_s28  ;;  %s79_s10 = int_to_ptr.hbm [resolvable:$true] %s78_s10 }
   0xd   :  { %56 = dma.hbm_to_vmem [thread:$0]  %s49_s25, 1024, %s51_s28, [#allocation6], %s748_s17, %s748_s17, %s749_s18  }
   0xe   :  { %s753_s0 = smov [#allocation10]  }
   0xf   :  { %s80_s11 = sshll.u32 %s753_s0, 4  ;;  %s81_s11 = int_to_ptr.vmem [resolvable:$true] %s80_s11 }
  0x10   :  { %86 = dma.hbm_to_vmem [thread:$0]  %s79_s10, 1024, %s81_s11, [#allocation9], %s748_s17, %s748_s17, %s749_s18  }
  0x11   :  { %739 = dma.done.wait [#allocation3], 128  }
  0x12   :  { %740 = vsyncadd [#allocation3], 4294967168 }
  0x13   :  { %741 = dma.done.wait [#allocation6], 1280  }
  0x14   :  { %742 = vsyncadd [#allocation6], 4294966016 }
  0x15   :  { %743 = dma.done.wait [#allocation9], 2048  }
  0x16   :  { %744 = vsyncadd [#allocation9], 4294965248  ;;  %v552_v0 = vld [vmem:[#allocation5 + $0x8] sm:$0xff]  ;;  %v551_v1 = vld [vmem:[#allocation5] sm:$0xff]  ;;  %vm132_vm0 = vcmask 261120   ;;  %s434_s19 = sshll.u32 %s844_s9, 4  ;;  %s435_s19 = int_to_ptr.hbm [resolvable:$true] %s434_s19 }
  0x17   :  { %v110_v2 = vld [vmem:[#allocation2] sm:$0xff]  ;;  %v560_v3 = vld [vmem:[#allocation7 + $0x38] sm:$0xff]  ;;  %142 = vmatpush.bf16.msra.mxu0 %v552_v0  ;;  %v559_v5 = vld [vmem:[#allocation7 + $0x30] sm:$0xff] }
  0x18   :  { %228 = vmatpush.bf16.msra.mxu1 %v560_v3  ;;  %v111_v4 = vpack.c.bf16 %v110_v2, %v110_v2  ;;  %v558_v6 = vld [vmem:[#allocation7 + $0x28] sm:$0xff]  ;;  %v557_v7 = vld [vmem:[#allocation7 + $0x20] sm:$0xff]  ;;  %v556_v8 = vld [vmem:[#allocation7 + $0x18] sm:$0xff] }
  0x19   :  { %v555_v9 = vld [vmem:[#allocation7 + $0x10] sm:$0xff]  ;;  %v554_v10 = vld [vmem:[#allocation7 + $0x8] sm:$0xff]  ;;  %v553_v11 = vld [vmem:[#allocation7] sm:$0xff] }
  0x1a   :  { %v585_v12 = vld [vmem:[%s837_s2] ss:$0 sm:$0xff]  ;;  %v568_v13 = vld [vmem:[#allocation8 + $0x38] sm:$0xff]  ;;  %v567_v28 = vld [vmem:[#allocation8 + $0x30] sm:$0xff] }
  0x1b   :  { %143 = vmatpush.bf16.msra.mxu0 %v551_v1  ;;  %320 = vmatpush.bf16.msra.mxu2 %v568_v13  ;;  %v566_v29 = vld [vmem:[#allocation8 + $0x28] sm:$0xff]  ;;  %v565_v30 = vld [vmem:[#allocation8 + $0x20] sm:$0xff]  ;;  %v564_v31 = vld [vmem:[#allocation8 + $0x18] sm:$0xff] }
  0x1c   :  { %229 = vmatpush.bf16.msra.mxu1 %v559_v5  ;;  %v563_v32 = vld [vmem:[#allocation8 + $0x10] sm:$0xff]  ;;  %v562_v33 = vld [vmem:[#allocation8 + $0x8] sm:$0xff]  ;;  %v561_v34 = vld [vmem:[#allocation8] sm:$0xff] }
  0x1d   :  { %v586_v35 = vld [vmem:[%s839_s4] ss:$0 sm:$0xff]  ;;  %v576_v36 = vld [vmem:[#allocation10 + $0x38] sm:$0xff]  ;;  %v575_v51 = vld [vmem:[#allocation10 + $0x30] sm:$0xff] }
  0x1e   :  { %454 = vmatmul.msk.bf16.vlgmr.msra.gmra.mxu0 %vm132_vm0, %v111_v4  ;;  %412 = vmatpush.bf16.msra.mxu3 %v576_v36  ;;  %v574_v52 = vld [vmem:[#allocation10 + $0x28] sm:$0xff]  ;;  %v573_v53 = vld [vmem:[#allocation10 + $0x20] sm:$0xff]  ;;  %v572_v54 = vld [vmem:[#allocation10 + $0x18] sm:$0xff] }
  0x1f   :  { %321 = vmatpush.bf16.msra.mxu2 %v567_v28  ;;  %v571_v55 = vld [vmem:[#allocation10 + $0x10] sm:$0xff]  ;;  %v570_v56 = vld [vmem:[#allocation10 + $0x8] sm:$0xff]  ;;  %v569_v57 = vld [vmem:[#allocation10] sm:$0xff] }
  0x20   :  { %230 = vmatpush.bf16.msra.mxu1 %v558_v6  ;;  %v587_v58 = vld [vmem:[%s841_s6] ss:$0 sm:$0xff]  ;;  %s754_s6 = smov [#allocation11]  }
  0x21   :  { %s432_s16 = sshll.u32 %s754_s6, 4  ;;  %s433_s16 = int_to_ptr.vmem [resolvable:$true] %s432_s16 }
  0x22   :  { %413 = vmatpush.bf16.msra.mxu3 %v575_v51 }
  0x23   :  { %322 = vmatpush.bf16.msra.mxu2 %v566_v29 }
  0x24   :  { %231 = vmatpush.bf16.msra.mxu1 %v557_v7 }
  0x26   :  { %414 = vmatpush.bf16.msra.mxu3 %v574_v52 }
  0x27   :  { %323 = vmatpush.bf16.msra.mxu2 %v565_v30 }
  0x28   :  { %232 = vmatpush.bf16.msra.mxu1 %v556_v8 }
  0x2a   :  { %415 = vmatpush.bf16.msra.mxu3 %v573_v53 }
  0x2b   :  { %324 = vmatpush.bf16.msra.mxu2 %v564_v31 }
  0x2c   :  { %233 = vmatpush.bf16.msra.mxu1 %v555_v9  ;;  %v588_v9 = vld [vmem:[%s843_s8] ss:$0 sm:$0xff] }
  0x2e   :  { %416 = vmatpush.bf16.msra.mxu3 %v572_v54 }
  0x2f   :  { %325 = vmatpush.bf16.msra.mxu2 %v563_v32 }
  0x30   :  { %234 = vmatpush.bf16.msra.mxu1 %v554_v10 }
  0x32   :  { %417 = vmatpush.bf16.msra.mxu3 %v571_v55 }
  0x33   :  { %326 = vmatpush.bf16.msra.mxu2 %v562_v33 }
  0x34   :  { %235 = vmatpush.bf16.msra.mxu1 %v553_v11 }
  0x36   :  { %418 = vmatpush.bf16.msra.mxu3 %v570_v56 }
  0x37   :  { %327 = vmatpush.bf16.msra.mxu2 %v561_v34 }
  0x3a   :  { %419 = vmatpush.bf16.msra.mxu3 %v569_v57 }
  0x9b   :  { %v145_v14 = vpop.f32.mrf.mxu0 }
  0x9c   :  { %v146_v15 = vadd.f32 %v585_v12, %v145_v14 }
  0x9e   :  { %v149_v16 = vmul.f32 0.5, %v146_v15 }
  0xa0   :  { %v150_v17 = vpack.c.bf16 %v149_v16, %v149_v16 }
  0xa2   :  { %v151_v18 = vunpack.c.l.bf16 %v150_v17 }
  0xa3   :  { %v147_v19 = vpop.f32.mrf.mxu0 }
  0xa4   :  { %589 = vtanh.f32 %v151_v18 }
  0xaa   :  { %v590_v20 = vpop.eup %589 }
  0xab   :  { %v153_v21 = vpack.c.bf16 %v590_v20, %v590_v20 }
  0xad   :  { %v154_v22 = vunpack.c.l.bf16 %v153_v21 }
  0xaf   :  { %v155_v23 = vmul.f32 0.5, %v154_v22 }
  0xb1   :  { %v156_v24 = vpack.c.bf16 %v155_v23, %v155_v23 }
  0xb3   :  { %v157_v25 = vunpack.c.l.bf16 %v156_v24 }
  0xb5   :  { %v158_v26 = vadd.f32 0.5, %v157_v25 }
  0xb7   :  { %v159_v27 = vpack.c.bf16 %v158_v26, %v158_v26 }
  0xb9   :  { %236 = vmatmul.bf16.vlgmr.msra.gmra.mxu1 %v159_v27 }
 0x136   :  { %v237_v37 = vpop.f32.mrf.mxu1 }
 0x137   :  { %v238_v38 = vadd.f32 %v586_v35, %v237_v37 }
 0x139   :  { %v241_v39 = vmul.f32 0.5, %v238_v38 }
 0x13b   :  { %v242_v40 = vpack.c.bf16 %v241_v39, %v241_v39 }
 0x13d   :  { %v243_v41 = vunpack.c.l.bf16 %v242_v40 }
 0x13e   :  { %v239_v42 = vpop.f32.mrf.mxu1 }
 0x13f   :  { %591 = vtanh.f32 %v243_v41 }
 0x145   :  { %v592_v43 = vpop.eup %591 }
 0x146   :  { %v245_v44 = vpack.c.bf16 %v592_v43, %v592_v43 }
 0x148   :  { %v246_v45 = vunpack.c.l.bf16 %v245_v44 }
 0x14a   :  { %v247_v46 = vmul.f32 0.5, %v246_v45 }
 0x14c   :  { %v248_v47 = vpack.c.bf16 %v247_v46, %v247_v46 }
 0x14e   :  { %v249_v48 = vunpack.c.l.bf16 %v248_v47 }
 0x150   :  { %v250_v49 = vadd.f32 0.5, %v249_v48 }
 0x152   :  { %v251_v50 = vpack.c.bf16 %v250_v49, %v250_v49 }
 0x154   :  { %328 = vmatmul.bf16.vlgmr.msra.gmra.mxu2 %v251_v50 }
 0x1d7   :  { %v329_v59 = vpop.f32.mrf.mxu2 }
 0x1d8   :  { %v330_v60 = vadd.f32 %v587_v58, %v329_v59 }
 0x1da   :  { %v333_v61 = vmul.f32 0.5, %v330_v60 }
 0x1dc   :  { %v334_v62 = vpack.c.bf16 %v333_v61, %v333_v61 }
 0x1de   :  { %v335_v63 = vunpack.c.l.bf16 %v334_v62 }
 0x1df   :  { %v331_v0 = vpop.f32.mrf.mxu2 }
 0x1e0   :  { %593 = vtanh.f32 %v335_v63 }
 0x1e6   :  { %v594_v1 = vpop.eup %593 }
 0x1e7   :  { %v337_v2 = vpack.c.bf16 %v594_v1, %v594_v1 }
 0x1e9   :  { %v338_v3 = vunpack.c.l.bf16 %v337_v2 }
 0x1eb   :  { %v339_v4 = vmul.f32 0.5, %v338_v3 }
 0x1ed   :  { %v340_v5 = vpack.c.bf16 %v339_v4, %v339_v4 }
 0x1ef   :  { %v341_v6 = vunpack.c.l.bf16 %v340_v5 }
 0x1f1   :  { %v342_v7 = vadd.f32 0.5, %v341_v6 }
 0x1f3   :  { %v343_v8 = vpack.c.bf16 %v342_v7, %v342_v7 }
 0x1f5   :  { %420 = vmatmul.bf16.vlgmr.msra.gmra.mxu3 %v343_v8 }
 0x278   :  { %v421_v10 = vpop.f32.mrf.mxu3 }
 0x279   :  { %v422_v11 = vadd.f32 %v588_v9, %v421_v10 }
 0x27b   :  { %v425_v12 = vpack.c.bf16 %v422_v11, %v422_v11 }
 0x27d   :  { %426 = vst [vmem:[#allocation11] sm:$0xf] %v425_v12 }
 0x27e   :  { %437 = dma.vmem_to_hbm [thread:$0]  %s433_s16, 64, %s435_s19, [#allocation4]  }
 0x280   :  { %v423_v13 = vpop.f32.mrf.mxu3 }
 0x281   :  { %745 = dma.done.wait [#allocation4], 64  }
 0x282   :  { %746 = vsyncadd [#allocation4], 4294967232 }
 0x283   :  { %442 = vsyncpa [#allocation3], 1 }
 0x284   :  { %443 = vsyncpa [#allocation6], 1 }
 0x285   :  { %444 = vsyncpa [#allocation9], 1 }
 0x286   :  { %445 = vsyncpa [#allocation4], 1 }

</bundles_post_ra>
